<compile_context>
chip_gen: v6e
topology: v6e:2x2x1
jax: 0.10.0
libtpu: 0.0.40
codegen_flags: <defaults>
</compile_context>

<pallas_src>
import functools
import numpy as np
import jax
import jax.numpy as jnp
from jax.experimental import pallas as pl
from jax.experimental.pallas import tpu as pltpu

BN_EPS = 1e-5
ACT_DTYPE = jnp.bfloat16          # on-the-wire dtype for activations/weights; accumulation is f32


def _round_up(x, m):
    return (x + m - 1) // m * m


@functools.lru_cache(maxsize=None)
def _device_kind():
    try:
        return jax.devices()[0].device_kind.lower()
    except Exception:
        return ""


@functools.lru_cache(maxsize=None)
def _is_v5():
    return "v5" in _device_kind()


@functools.lru_cache(maxsize=None)
def _vmem_capacity_bytes():
    try:
        info = pltpu.get_tpu_info()
        cap = getattr(info, "vmem_capacity_bytes", None)
        if cap:
            return int(cap)
    except Exception:
        pass
    return 64 * 1024 * 1024       # conservative (v7x physical VMEM per core)


def _pick_tm(M):
    # largest tile dividing M that still leaves >= 2 programs on the M axis (v7x dual-core)
    for t in (512, 256, 128, 64, 32, 16, 8):
        if M % t == 0 and (M // t >= 2 or M <= 8):
            return t
    return 8


def _pick_tn(N):
    big = 128 if _is_v5() else 256        # v5e MXU is 128x128; v6e/v7x are 256-deep
    if N % big == 0 and N >= big:
        return big
    if N % 128 == 0:
        return 128
    return N


def _pick_tk(K):
    if K <= 1024:
        return K                           # single reduction step, no K padding ever needed
    for t in (512, 256, 128):
        if K % t == 0:
            return t
    return K


# ----------------------------------------------------------------------------
# Pallas matmul (bias + optional residual + optional ReLU fused in the epilogue)
# ----------------------------------------------------------------------------
def _matmul_kernel(a_ref, b_ref, bias_ref, *rest, relu, has_res):
    if has_res:
        res_ref, o_ref, acc_ref = rest
    else:
        o_ref, acc_ref = rest
        res_ref = None

    k = pl.program_id(2)

    @pl.when(k == 0)
    def _():
        acc_ref[...] = jnp.zeros_like(acc_ref)

    acc_ref[...] += jnp.dot(a_ref[...], b_ref[...], preferred_element_type=jnp.float32)

    @pl.when(k == pl.num_programs(2) - 1)
    def _():
        out = acc_ref[...] + bias_ref[...].astype(jnp.float32)
        if has_res:
            out = out + res_ref[...].astype(jnp.float32)
        if relu:
            out = jnp.maximum(out, 0.0)
        o_ref[...] = out.astype(o_ref.dtype)


@functools.lru_cache(maxsize=None)
def _build_matmul(M, K, N, tm, tn, tk, relu, has_res, out_dtype):
    grid = (M // tm, N // tn, K // tk)
    in_specs = [
        pl.BlockSpec((tm, tk), lambda i, j, k: (i, k)),
        pl.BlockSpec((tk, tn), lambda i, j, k: (k, j)),
        pl.BlockSpec((1, tn), lambda i, j, k: (0, j)),
    ]
    if has_res:
        in_specs.append(pl.BlockSpec((tm, tn), lambda i, j, k: (i, j)))
    return pl.pallas_call(
        functools.partial(_matmul_kernel, relu=relu, has_res=has_res),
        out_shape=jax.ShapeDtypeStruct((M, N), jnp.dtype(out_dtype)),
        grid_spec=pltpu.PrefetchScalarGridSpec(
            num_scalar_prefetch=0,
            grid=grid,
            in_specs=in_specs,
            out_specs=pl.BlockSpec((tm, tn), lambda i, j, k: (i, j)),
            scratch_shapes=[pltpu.VMEM((tm, tn), jnp.float32)],
        ),
        compiler_params=pltpu.CompilerParams(
            dimension_semantics=("parallel", "parallel", "arbitrary")),
    )


def pallas_matmul(a, b, bias=None, relu=False, residual=None, out_dtype=ACT_DTYPE):
    """out = a @ b + bias (+ residual) (+ ReLU). f32 accumulation regardless of operand dtype."""
    M, K = a.shape
    Kb, N = b.shape
    assert K == Kb
    b = b.astype(a.dtype)

    # lane-dense stores: pad narrow / ragged output-channel counts to a multiple of 128
    Np = max(_round_up(N, 128), 128)
    if Np != N:
        b = jnp.pad(b, ((0, 0), (0, Np - N)))
    if bias is None:
        bias_p = jnp.zeros((1, Np), jnp.float32)
    else:
        bias_p = bias.astype(jnp.float32).reshape(1, N)
        if Np != N:
            bias_p = jnp.pad(bias_p, ((0, 0), (0, Np - N)))
    res_p = None
    if residual is not None:
        res_p = residual.astype(a.dtype)
        if Np != N:
            res_p = jnp.pad(res_p, ((0, 0), (0, Np - N)))

    Mp = _round_up(M, 8)
    if Mp != M:                                   # only tiny ragged M (e.g. pooled branch M=2)
        a = jnp.pad(a, ((0, Mp - M), (0, 0)))
        if res_p is not None:
            res_p = jnp.pad(res_p, ((0, Mp - M), (0, 0)))

    tm, tn, tk = _pick_tm(Mp), _pick_tn(Np), _pick_tk(K)
    args = [a, b, bias_p] + ([res_p] if res_p is not None else [])
    out = _build_matmul(Mp, K, Np, tm, tn, tk, bool(relu),
                        res_p is not None, jnp.dtype(out_dtype).name)(*args)
    if Mp != M or Np != N:
        out = out[:M, :N]
    return out


# ----------------------------------------------------------------------------
# Direct (im2col-free) KxK stride-1 convolution, row-tiled, VMEM f32 accumulator
# ----------------------------------------------------------------------------
def _direct_conv_kernel(x_ref, w_ref, b_ref, o_ref, acc_ref, *, kh, kw, dil, relu):
    tr, ow, tn = o_ref.shape[1], o_ref.shape[2], o_ref.shape[3]
    cin = x_ref.shape[-1]
    r0 = pl.program_id(1) * tr
    if tr & (tr - 1) == 0:
        r0 = pl.multiple_of(r0, tr)
    acc_ref[...] = jnp.zeros_like(acc_ref)
    for ki in range(kh):
        for kj in range(kw):
            win = x_ref[0, pl.ds(r0 + ki * dil, tr), kj * dil:kj * dil + ow, :]
            acc_ref[...] += jnp.dot(win.reshape(tr * ow, cin), w_ref[ki, kj],
                                    preferred_element_type=jnp.float32)
    out = acc_ref[...] + b_ref[...]
    if relu:
        out = jnp.maximum(out, 0.0)
    o_ref[0] = out.reshape(tr, ow, tn).astype(o_ref.dtype)


@functools.lru_cache(maxsize=None)
def _build_direct_conv(N, Hp, Wp, Cin, Cout, kh, kw, dil, oh, ow, tr, tn,
                       relu, out_dtype, vmem_limit):
    return pl.pallas_call(
        functools.partial(_direct_conv_kernel, kh=kh, kw=kw, dil=dil, relu=relu),
        out_shape=jax.ShapeDtypeStruct((N, oh, ow, Cout), jnp.dtype(out_dtype)),
        grid_spec=pltpu.PrefetchScalarGridSpec(
            num_scalar_prefetch=0,
            grid=(N, oh // tr, Cout // tn),
            in_specs=[
                pl.BlockSpec((1, Hp, Wp, Cin), lambda n, r, j: (n, 0, 0, 0)),
                pl.BlockSpec((kh, kw, Cin, tn), lambda n, r, j: (0, 0, 0, j)),
                pl.BlockSpec((1, tn), lambda n, r, j: (0, j)),
            ],
            out_specs=pl.BlockSpec((1, tr, ow, tn), lambda n, r, j: (n, r, 0, j)),
            scratch_shapes=[pltpu.VMEM((tr * ow, tn), jnp.float32)],
        ),
        compiler_params=pltpu.CompilerParams(
            dimension_semantics=("parallel", "parallel", "parallel"),
            vmem_limit_bytes=int(vmem_limit)),
    )


def _pick_tr(oh, ow):
    best = 1
    for t in range(1, oh + 1):
        if oh % t == 0 and t * ow <= 1024:
            best = t
    return best


def _direct_conv_budget(Hp, Wp, Cin, kh, kw, tn, tr, ow):
    x_bytes = Hp * Wp * Cin * 2
    w_bytes = kh * kw * Cin * tn * 2
    o_bytes = tr * ow * tn * 2
    acc_bytes = tr * ow * tn * 4
    need = 2 * (x_bytes + w_bytes + o_bytes) + acc_bytes + (2 << 20)
    return need


# ----------------------------------------------------------------------------
# im2col fallback (stride-2 convs + small-Cin 3x3 convs where K = kh*kw*Cin fills the MXU)
# ----------------------------------------------------------------------------
def im2col(x, kh, kw, stride, padding, dilation, pad_value=0.0):
    N, H, W, C = x.shape
    xp = jnp.pad(x, ((0, 0), (padding, padding), (padding, padding), (0, 0)),
                 constant_values=pad_value)
    OH = (H + 2 * padding - (dilation * (kh - 1) + 1)) // stride + 1
    OW = (W + 2 * padding - (dilation * (kw - 1) + 1)) // stride + 1
    cols = []
    for i in range(kh):
        for j in range(kw):
            r0, c0 = i * dilation, j * dilation
            cols.append(xp[:, r0:r0 + stride * (OH - 1) + 1:stride,
                           c0:c0 + stride * (OW - 1) + 1:stride, :])
    return jnp.concatenate(cols, axis=-1), OH, OW


def conv2d(x, w, b=None, stride=1, padding=0, dilation=1, relu=False,
           residual=None, out_dtype=ACT_DTYPE):
    """x: [N,H,W,Cin] (ACT_DTYPE), w: [kh,kw,Cin,Cout] (ACT_DTYPE), b: [Cout] f32 or None."""
    kh, kw, Cin, Cout = w.shape
    N, H, W, _ = x.shape

    if kh == 1 and kw == 1:
        if stride > 1:
            x = x[:, ::stride, ::stride, :]
        OH, OW = x.shape[1], x.shape[2]
        a = x.reshape(N * OH * OW, Cin)
        res2d = None if residual is None else residual.reshape(N * OH * OW, Cout)
        out = pallas_matmul(a, w.reshape(Cin, Cout), b, relu=relu,
                            residual=res2d, out_dtype=out_dtype)
        return out.reshape(N, OH, OW, Cout)

    OH = (H + 2 * padding - dilation * (kh - 1) - 1) // stride + 1
    OW = (W + 2 * padding - dilation * (kw - 1) - 1) // stride + 1

    use_direct = (stride == 1 and residual is None
                  and Cin >= 256 and Cin % 128 == 0
                  and Cout % 128 == 0 and OW % 8 == 0)
    if use_direct:
        Hp, Wp = H + 2 * padding, W + 2 * padding
        tn = _pick_tn(Cout)
        tr = _pick_tr(OH, OW)
        need = _direct_conv_budget(Hp, Wp, Cin, kh, kw, tn, tr, OW)
        cap = _vmem_capacity_bytes()
        if need <= int(cap * 0.6):
            vmem_limit = min(cap * 3 // 4, max(need + (8 << 20), 32 << 20))
            xp = jnp.pad(x, ((0, 0), (padding, padding), (padding, padding), (0, 0)))
            bias = jnp.zeros((Cout,), jnp.float32) if b is None else b.astype(jnp.float32)
            return _build_direct_conv(N, Hp, Wp, Cin, Cout, kh, kw, dilation,
                                      OH, OW, tr, tn, bool(relu),
                                      jnp.dtype(out_dtype).name, vmem_limit)(
                xp, w.astype(x.dtype), bias.reshape(1, Cout))

    cols, OH, OW = im2col(x, kh, kw, stride, padding, dilation)
    a = cols.reshape(N * OH * OW, kh * kw * Cin)
    res2d = None if residual is None else residual.reshape(N * OH * OW, Cout)
    out = pallas_matmul(a, w.reshape(kh * kw * Cin, Cout), b, relu=relu,
                        residual=res2d, out_dtype=out_dtype)
    return out.reshape(N, OH, OW, Cout)


# ----------------------------------------------------------------------------
# Stem max pool (3x3 / stride 2 / pad 1): 4 parity planes + in-kernel max over 9 windows
# ----------------------------------------------------------------------------
def _maxpool_kernel(p00_ref, p01_ref, p10_ref, p11_ref, o_ref):
    oh, ow = o_ref.shape[1], o_ref.shape[2]
    planes = ((p00_ref, p01_ref), (p10_ref, p11_ref))
    out = None
    for r in range(3):
        for c in range(3):
            pref = planes[r % 2][c % 2]
            win = pref[0, r // 2:r // 2 + oh, c // 2:c // 2 + ow, :]
            out = win if out is None else jnp.maximum(out, win)
    o_ref[0] = out


@functools.lru_cache(maxsize=None)
def _build_maxpool(N, plane_shapes, OH, OW, C, dtype):
    in_specs = [pl.BlockSpec((1, ph, pw, C), lambda n: (n, 0, 0, 0))
                for (ph, pw) in plane_shapes]
    return pl.pallas_call(
        _maxpool_kernel,
        out_shape=jax.ShapeDtypeStruct((N, OH, OW, C), jnp.dtype(dtype)),
        grid=(N,),
        in_specs=in_specs,
        out_specs=pl.BlockSpec((1, OH, OW, C), lambda n: (n, 0, 0, 0)),
        compiler_params=pltpu.CompilerParams(dimension_semantics=("parallel",)),
    )


def maxpool_3x3_s2(x):
    N, H, W, C = x.shape
    xp = jnp.pad(x, ((0, 0), (1, 1), (1, 1), (0, 0)), constant_values=-1e30)
    OH = (H - 1) // 2 + 1
    OW = (W - 1) // 2 + 1
    p00 = xp[:, 0::2, 0::2, :]
    p01 = xp[:, 0::2, 1::2, :]
    p10 = xp[:, 1::2, 0::2, :]
    p11 = xp[:, 1::2, 1::2, :]
    shapes = tuple((p.shape[1], p.shape[2]) for p in (p00, p01, p10, p11))
    return _build_maxpool(N, shapes, OH, OW, C, jnp.dtype(x.dtype).name)(p00, p01, p10, p11)


# ----------------------------------------------------------------------------
# ASPP global average pooling as a selector matmul (MXU reduction, K-pipelined)
# ----------------------------------------------------------------------------
@functools.lru_cache(maxsize=None)
def _avgpool_selector(N, HW, dtype):
    sel = np.zeros((N, N * HW), np.float32)
    for n in range(N):
        sel[n, n * HW:(n + 1) * HW] = 1.0
    return jnp.asarray(sel, dtype=jnp.dtype(dtype))


def global_avgpool(x):
    """x: [N,H,W,C] -> [N,1,1,C] (mean over H,W), f32 output."""
    N, H, W, C = x.shape
    HW = H * W
    sel = _avgpool_selector(N, HW, jnp.dtype(x.dtype).name)
    summed = pallas_matmul(sel, x.reshape(N * HW, C), out_dtype=jnp.float32)   # [N, C]
    return (summed * (1.0 / HW)).reshape(N, 1, 1, C)


# ----------------------------------------------------------------------------
# Bilinear interpolation (align_corners=False) as a single lane-dense Pallas matmul
# out[N*C, out_h*out_w] = x[N*C, H*W] @ A^T  -> output is already NCHW
# ----------------------------------------------------------------------------
def bilinear_matrix(out_size, in_size):
    scale = in_size / out_size
    i = np.arange(out_size, dtype=np.float64)
    src = np.maximum((i + 0.5) * scale - 0.5, 0.0)
    i0 = np.minimum(np.floor(src).astype(np.int64), in_size - 1)
    i1 = np.minimum(i0 + 1, in_size - 1)
    frac = src - i0
    A = np.zeros((out_size, in_size), dtype=np.float32)
    np.add.at(A, (np.arange(out_size), i0), 1.0 - frac)
    np.add.at(A, (np.arange(out_size), i1), frac)
    return A


@functools.lru_cache(maxsize=None)
def _bilinear_AT(out_h, out_w, H, W):
    Ah, Aw = bilinear_matrix(out_h, H), bilinear_matrix(out_w, W)
    A = (Ah[:, None, :, None] * Aw[None, :, None, :]).reshape(out_h * out_w, H * W)
    return jnp.asarray(np.ascontiguousarray(A.T))          # [H*W, out_h*out_w] f32


def bilinear_upsample_to_nchw(x, out_h, out_w):
    """x: [N,H,W,C] -> [N,C,out_h,out_w] f32, align_corners=False."""
    N, H, W, C = x.shape
    x = x.astype(jnp.float32)
    if H * W <= 1024:
        AT = _bilinear_AT(out_h, out_w, H, W)
        xf = jnp.transpose(x, (0, 3, 1, 2)).reshape(N * C, H * W)
        out = pallas_matmul(xf, AT, out_dtype=jnp.float32)          # [N*C, out_h*out_w]
        return out.reshape(N, C, out_h, out_w)
    # separable fallback for large feature maps (A^T would be too big to materialize)
    Ah, Aw = jnp.asarray(bilinear_matrix(out_h, H)), jnp.asarray(bilinear_matrix(out_w, W))
    t = jnp.transpose(x, (1, 0, 2, 3)).reshape(H, N * W * C)
    t = pallas_matmul(Ah, t, out_dtype=jnp.float32).reshape(out_h, N, W, C)
    t = jnp.transpose(t, (2, 1, 0, 3)).reshape(W, N * out_h * C)
    t = pallas_matmul(Aw, t, out_dtype=jnp.float32).reshape(out_w, N, out_h, C)
    return jnp.transpose(t, (1, 3, 2, 0))


# ----------------------------------------------------------------------------
# Deterministic parameter initialization (shapes follow deeplabv3_resnet50, output stride 8)
# ----------------------------------------------------------------------------
class ParamGen:
    def __init__(self, seed=0):
        self.key = jax.random.PRNGKey(seed)

    def _next(self):
        self.key, sub = jax.random.split(self.key)
        return sub

    def conv(self, kh, kw, cin, cout):
        fan_in = kh * kw * cin
        return (0.5 / np.sqrt(fan_in)) * jax.random.normal(
            self._next(), (kh, kw, cin, cout), jnp.float32)

    def bn(self, c):
        gamma = 1.0 + 0.1 * jax.random.normal(self._next(), (c,), jnp.float32)
        beta = 0.1 * jax.random.normal(self._next(), (c,), jnp.float32)
        mean = 0.1 * jax.random.normal(self._next(), (c,), jnp.float32)
        var = 1.0 + 0.1 * jax.random.uniform(self._next(), (c,), jnp.float32)
        return (gamma, beta, mean, var)

    def bias(self, c):
        return 0.01 * jax.random.normal(self._next(), (c,), jnp.float32)


def make_bottleneck(pg, inplanes, planes, stride, dilation, downsample):
    p = {
        'conv1': pg.conv(1, 1, inplanes, planes), 'bn1': pg.bn(planes),
        'conv2': pg.conv(3, 3, planes, planes),   'bn2': pg.bn(planes),
        'conv3': pg.conv(1, 1, planes, planes * 4), 'bn3': pg.bn(planes * 4),
        'stride': stride, 'dilation': dilation,
    }
    if downsample:
        p['down_w'] = pg.conv(1, 1, inplanes, planes * 4)
        p['down_bn'] = pg.bn(planes * 4)
    return p


def make_layer(pg, inplanes, planes, blocks, stride, dilate, dilation):
    previous_dilation = dilation
    if dilate:
        dilation *= stride
        stride = 1
    downsample = (stride != 1) or (inplanes != planes * 4)
    layer = [make_bottleneck(pg, inplanes, planes, stride, previous_dilation, downsample)]
    inplanes = planes * 4
    for _ in range(1, blocks):
        layer.append(make_bottleneck(pg, inplanes, planes, 1, dilation, False))
    return layer, inplanes, dilation


def init_params(num_classes=32, seed=0):
    pg = ParamGen(seed)
    p = {'conv1': pg.conv(7, 7, 3, 64), 'bn1': pg.bn(64)}
    inplanes, dilation = 64, 1
    # ResNet-50 with replace_stride_with_dilation=[False, True, True] (output stride 8)
    cfg = [(64, 3, 1, False), (128, 4, 2, False), (256, 6, 2, True), (512, 3, 2, True)]
    for idx, (planes, blocks, stride, dilate) in enumerate(cfg, start=1):
        layer, inplanes, dilation = make_layer(pg, inplanes, planes, blocks, stride, dilate, dilation)
        p[f'layer{idx}'] = layer
    aspp = {'b0_w': pg.conv(1, 1, 2048, 256), 'b0_bn': pg.bn(256)}
    for i, _rate in enumerate([12, 24, 36]):
        aspp[f'b{i + 1}_w'] = pg.conv(3, 3, 2048, 256)
        aspp[f'b{i + 1}_bn'] = pg.bn(256)
    aspp['pool_w'] = pg.conv(1, 1, 2048, 256); aspp['pool_bn'] = pg.bn(256)
    aspp['proj_w'] = pg.conv(1, 1, 5 * 256, 256); aspp['proj_bn'] = pg.bn(256)
    p['classifier'] = {
        'aspp': aspp,
        'head_w': pg.conv(3, 3, 256, 256), 'head_bn': pg.bn(256),
        'cls_w': pg.conv(1, 1, 256, num_classes), 'cls_b': pg.bias(num_classes),
    }
    return p


def _fold(w, bn):
    gamma, beta, mean, var = bn
    scale = gamma / jnp.sqrt(var + BN_EPS)
    return (w * scale).astype(ACT_DTYPE), (beta - mean * scale).astype(jnp.float32)


def fold_params(p):
    """Fold BN (eval-mode running stats) into conv weights ONCE; cast weights to bf16."""
    f = {}
    f['conv1_w'], f['conv1_b'] = _fold(p['conv1'], p['bn1'])
    for name in ('layer1', 'layer2', 'layer3', 'layer4'):
        blocks = []
        for blk in p[name]:
            fb = {'stride': blk['stride'], 'dilation': blk['dilation']}
            fb['conv1_w'], fb['conv1_b'] = _fold(blk['conv1'], blk['bn1'])
            fb['conv2_w'], fb['conv2_b'] = _fold(blk['conv2'], blk['bn2'])
            fb['conv3_w'], fb['conv3_b'] = _fold(blk['conv3'], blk['bn3'])
            if 'down_w' in blk:
                fb['down_w'], fb['down_b'] = _fold(blk['down_w'], blk['down_bn'])
            blocks.append(fb)
        f[name] = blocks
    c = p['classifier']
    a = c['aspp']
    fa = {}
    fa['b0_w'], fa['b0_b'] = _fold(a['b0_w'], a['b0_bn'])
    for i in range(1, 4):
        w3, b3 = _fold(a[f'b{i}_w'], a[f'b{i}_bn'])
        fa[f'b{i}_w'], fa[f'b{i}_b'] = w3, b3
        fa[f'b{i}_w_center'] = w3[1:2, 1:2]        # used when dilated conv degenerates to 1x1
    fa['pool_w'], fa['pool_b'] = _fold(a['pool_w'], a['pool_bn'])
    proj_w, proj_b = _fold(a['proj_w'], a['proj_bn'])
    fa['proj_w_main'] = proj_w[:, :, :1024, :]     # spatial branches (4 x 256 channels)
    fa['proj_w_pool'] = proj_w[0, 0, 1024:, :]     # pooled branch (256 -> 256)
    fa['proj_b'] = proj_b
    head_w, head_b = _fold(c['head_w'], c['head_bn'])
    f['classifier'] = {
        'aspp': fa,
        'head_w': head_w, 'head_b': head_b,
        'cls_w': c['cls_w'].astype(ACT_DTYPE), 'cls_b': c['cls_b'].astype(jnp.float32),
    }
    return f


# ----------------------------------------------------------------------------
# Forward pass
# ----------------------------------------------------------------------------
def bottleneck_forward(x, p):
    identity = x
    if 'down_w' in p:
        identity = conv2d(x, p['down_w'], p['down_b'], stride=p['stride'], relu=False)
    out = conv2d(x, p['conv1_w'], p['conv1_b'], relu=True)
    out = conv2d(out, p['conv2_w'], p['conv2_b'], stride=p['stride'],
                 padding=p['dilation'], dilation=p['dilation'], relu=True)
    # conv3 + BN + residual-add + ReLU fused into one Pallas matmul epilogue
    return conv2d(out, p['conv3_w'], p['conv3_b'], relu=True, residual=identity)


def aspp_forward(x, p):
    N, H, W, _ = x.shape
    branches = [conv2d(x, p['b0_w'], p['b0_b'], relu=True)]
    for i, rate in enumerate((12, 24, 36), start=1):
        if H <= rate and W <= rate:
            # exact: padding == dilation == rate >= H,W, every off-centre tap only reads
            # zero padding, so the dilated 3x3 conv equals a 1x1 conv with the centre tap.
            branches.append(conv2d(x, p[f'b{i}_w_center'], p[f'b{i}_b'], relu=True))
        else:
            branches.append(conv2d(x, p[f'b{i}_w'], p[f'b{i}_b'],
                                   padding=rate, dilation=rate, relu=True))
    # ASPPPooling: AdaptiveAvgPool2d(1) -> 1x1 conv/BN/ReLU (broadcast back == per-image bias)
    pooled = global_avgpool(x).astype(ACT_DTYPE)                     # [N,1,1,2048]
    pooled = conv2d(pooled, p['pool_w'], p['pool_b'], relu=True)     # [N,1,1,256]
    # projection: concat(spatial) @ W[:1024] + pooled @ W[1024:] + b, ReLU fused in epilogue
    pool_proj = pallas_matmul(pooled.reshape(N, -1), p['proj_w_pool'],
                              out_dtype=jnp.float32)                 # [N,256] pre-ReLU term
    xcat = jnp.concatenate(branches, axis=-1)                        # [N,H,W,1024]
    res = jnp.broadcast_to(pool_proj[:, None, None, :].astype(ACT_DTYPE),
                           (N, H, W, pool_proj.shape[-1]))
    out = conv2d(xcat, p['proj_w_main'], p['proj_b'], relu=True, residual=res)
    # Dropout(0.5): identity in eval mode
    return out


def classifier_forward(x, p):
    x = aspp_forward(x, p['aspp'])
    x = conv2d(x, p['head_w'], p['head_b'], padding=1, relu=True)
    return conv2d(x, p['cls_w'], p['cls_b'], out_dtype=jnp.float32)  # final 1x1 -> num_classes


def deeplabv3_forward(params, x_nchw):
    x = jnp.transpose(x_nchw, (0, 2, 3, 1)).astype(ACT_DTYPE)        # NCHW -> NHWC, bf16
    in_h, in_w = x.shape[1], x.shape[2]
    # stem: 7x7/2 conv + BN + ReLU (im2col: stride-2, runs once), 3x3/2 maxpool
    x = conv2d(x, params['conv1_w'], params['conv1_b'], stride=2, padding=3, relu=True)
    x = maxpool_3x3_s2(x)
    for name in ('layer1', 'layer2', 'layer3', 'layer4'):
        for blk in params[name]:
            x = bottleneck_forward(x, blk)
    x = classifier_forward(x, params['classifier'])                  # [N, H/8, W/8, num_classes]
    return bilinear_upsample_to_nchw(x, in_h, in_w)                  # NCHW f32 ('out')


# TODO(synk): train-mode BatchNorm (batch statistics) and active Dropout are not modeled;
#             eval/inference semantics (and random weights, not the COCO checkpoint) are used.

if __name__ == "__main__":
    num_classes = 32
    raw_params = init_params(num_classes=num_classes, seed=0)
    params = fold_params(raw_params)          # BN fold + bf16 cast done ONCE, outside the forward
    params = jax.block_until_ready(params)

    key = jax.random.PRNGKey(0)
    x = jax.random.normal(key, (2, 3, 64, 64), dtype=jnp.float32)    # NCHW like PyTorch

    out = deeplabv3_forward(params, x)
    out = jax.block_until_ready(out)

    assert out.shape == (2, num_classes, 64, 64), out.shape
    assert bool(jnp.isfinite(out).all())
    print("KERNEL_OK")
</pallas_src>

<mosaic_0001>
module attributes {stable_mosaic.version = 11 : i64} {
  func.func @_matmul_kernel(%arg0: i32, %arg1: i32, %arg2: i32, %arg3: memref<512x147xbf16, #tpu.memory_space<vmem>>, %arg4: memref<147x128xbf16, #tpu.memory_space<vmem>>, %arg5: memref<1x128xf32, #tpu.memory_space<vmem>>, %arg6: memref<512x128xbf16, #tpu.memory_space<vmem>>, %arg7: memref<512x128xf32, #tpu.memory_space<vmem>>) attributes {dimension_semantics = [#tpu.dimension_semantics<parallel>, #tpu.dimension_semantics<parallel>, #tpu.dimension_semantics<arbitrary>], iteration_bounds = array<i64: 4, 1, 1>, scalar_prefetch = 0 : i64, scratch_operands = 1 : i64, tpu.core_type = #tpu.core_type<tc>, window_params = [{transform_indices = @transform_0, window_bounds = array<i64: 512, 147>}, {transform_indices = @transform_1, window_bounds = array<i64: 147, 128>}, {transform_indices = @transform_2, window_bounds = array<i64: 1, 128>}, {transform_indices = @transform_3, window_bounds = array<i64: 512, 128>}]} {
    %c0_i32 = arith.constant 0 : i32
    %0 = arith.cmpi eq, %arg2, %c0_i32 : i32
    %1 = arith.extui %0 : i1 to i32
    %c0_i32_0 = arith.constant 0 : i32
    %2 = arith.cmpi ne, %1, %c0_i32_0 : i32
    scf.if %2 {
      %cst_10 = arith.constant 0.000000e+00 : f32
      %12 = vector.broadcast %cst_10 : f32 to vector<512x128xf32>
      %c0_11 = arith.constant 0 : index
      %c0_12 = arith.constant 0 : index
      %13 = vector.load %arg7[%c0_11, %c0_12] : memref<512x128xf32, #tpu.memory_space<vmem>>, vector<512x128xf32>
      tpu.vector_store %arg7[%c0_11, %c0_12], %12 {strides = array<i32>} : memref<512x128xf32, #tpu.memory_space<vmem>>, vector<512x128xf32>,
    } else {
    }
    %c0 = arith.constant 0 : index
    %c0_1 = arith.constant 0 : index
    %3 = vector.load %arg7[%c0, %c0_1] : memref<512x128xf32, #tpu.memory_space<vmem>>, vector<512x128xf32>
    %c0_2 = arith.constant 0 : index
    %c0_3 = arith.constant 0 : index
    %4 = vector.load %arg3[%c0_2, %c0_3] : memref<512x147xbf16, #tpu.memory_space<vmem>>, vector<512x147xbf16>
    %c0_4 = arith.constant 0 : index
    %c0_5 = arith.constant 0 : index
    %5 = vector.load %arg4[%c0_4, %c0_5] : memref<147x128xbf16, #tpu.memory_space<vmem>>, vector<147x128xbf16>
    %cst = arith.constant dense<0.000000e+00> : vector<512x128xf32>
    %6 = tpu.matmul %4, %5, %cst {dimension_numbers = #tpu.dot_dimension_numbers<[1], [0], [0], [1], [0, 0, 1, 1], [], []>} : vector<512x147xbf16>, vector<147x128xbf16>, vector<512x128xf32> -> vector<512x128xf32>
    %7 = arith.addf %3, %6 : vector<512x128xf32>
    %c0_6 = arith.constant 0 : index
    %c0_7 = arith.constant 0 : index
    %8 = vector.load %arg7[%c0_6, %c0_7] : memref<512x128xf32, #tpu.memory_space<vmem>>, vector<512x128xf32>
    tpu.vector_store %arg7[%c0_6, %c0_7], %7 {strides = array<i32>} : memref<512x128xf32, #tpu.memory_space<vmem>>, vector<512x128xf32>,
    %c0_i32_8 = arith.constant 0 : i32
    %9 = arith.cmpi eq, %arg2, %c0_i32_8 : i32
    %10 = arith.extui %9 : i1 to i32
    %c0_i32_9 = arith.constant 0 : i32
    %11 = arith.cmpi ne, %10, %c0_i32_9 : i32
    scf.if %11 {
      %c0_10 = arith.constant 0 : index
      %c0_11 = arith.constant 0 : index
      %12 = vector.load %arg7[%c0_10, %c0_11] : memref<512x128xf32, #tpu.memory_space<vmem>>, vector<512x128xf32>
      %c0_12 = arith.constant 0 : index
      %c0_13 = arith.constant 0 : index
      %13 = vector.load %arg5[%c0_12, %c0_13] : memref<1x128xf32, #tpu.memory_space<vmem>>, vector<1x128xf32>
      %14 = vector.broadcast %13 : vector<1x128xf32> to vector<512x128xf32>
      %15 = arith.addf %12, %14 : vector<512x128xf32>
      %cst_14 = arith.constant 0.000000e+00 : f32
      %16 = vector.broadcast %cst_14 : f32 to vector<512x128xf32>
      %17 = arith.maximumf %15, %16 : vector<512x128xf32>
      %18 = arith.truncf %17 : vector<512x128xf32> to vector<512x128xbf16>
      %c0_15 = arith.constant 0 : index
      %c0_16 = arith.constant 0 : index
      %19 = vector.load %arg6[%c0_15, %c0_16] : memref<512x128xbf16, #tpu.memory_space<vmem>>, vector<512x128xbf16>
      tpu.vector_store %arg6[%c0_15, %c0_16], %18 {strides = array<i32>} : memref<512x128xbf16, #tpu.memory_space<vmem>>, vector<512x128xbf16>,
    } else {
    }
    return
  }
  func.func @transform_0(%arg0: i32, %arg1: i32, %arg2: i32) -> (i32, i32) {
    %c0_i32 = arith.constant 0 : i32
    return %arg0, %arg2 : i32, i32
  }
  func.func @transform_1(%arg0: i32, %arg1: i32, %arg2: i32) -> (i32, i32) {
    %c0_i32 = arith.constant 0 : i32
    return %arg2, %arg1 : i32, i32
  }
  func.func @transform_2(%arg0: i32, %arg1: i32, %arg2: i32) -> (i32, i32) {
    %c0_i32 = arith.constant 0 : i32
    %c0_i32_0 = arith.constant 0 : i32
    return %c0_i32, %arg1 : i32, i32
  }
  func.func @transform_3(%arg0: i32, %arg1: i32, %arg2: i32) -> (i32, i32) {
    %c0_i32 = arith.constant 0 : i32
    return %arg0, %arg1 : i32, i32
  }
}

</mosaic_0001>

<bundles_post_ra>
// kernel: tpu_custom_call.1
= control target key start
LH: loop header
LB: loop body
LE: loop exit
PB: predicated region body
PF: predicated region fallthrough
CT: control target
= control target key end

     0   :  { %8 = vsyncpa [#allocation4], 0  ;;  %s3070_s0 = inlined_call_operand.vmem [shape: bf16[2048,147], index: 0, kind: input, shape index: {}]   ;;  %s3071_s1 = inlined_call_operand.vmem [shape: bf16[147,128], index: 1, kind: input, shape index: {}]   ;;  %s3072_s2 = inlined_call_operand.vmem [shape: f32[1,128], index: 2, kind: input, shape index: {}]   ;;  %s3073_s3 = inlined_call_operand.hbm [shape: bf16[2048,128], index: 3, kind: output, shape index: {}]  }
   0x1   :  { %10 = vsyncpa [#allocation4 + $0x1], 0  ;;  %s2721_s12 = smov 0   ;;  %s2723_s13 = smov 0  }
   0x2   :  { %s2725_s14 = smov 0   ;;  %s2727_s15 = smov 0  }
   0x3   :  { %s2729_s16 = smov 0   ;;  %s2731_s17 = smov 0  }
   0x4 LB: > { %s1989_s18 = sadd.s32 4294967295, %s2694_s17   ;;  %s1990_s19 = sadd.s32 4294967294, %s2694_s17   ;;  %s2694_s17 = sphi %s2731_s17, %s16_s17   ;;  %s2690_s16 = sphi %s2729_s16, %s3080_s16   ;;  %s2686_s15 = sphi %s2727_s15, %s3079_s15   ;;  %s2682_s14 = sphi %s2725_s14, %s3078_s14   ;;  %s2678_s13 = sphi %s2723_s13, %s3077_s13   ;;  %s2674_s12 = sphi %s2721_s12, %s3076_s12  }
   0x5   : > { %s35_s20 = sadd.s32 1, %s2690_s16  ;;  %s126_s21 = sadd.s32 1, %s2682_s14 }
   0x6   : > { %p37_p0 = scmp.ge.s32.totalorder %s35_s20, 4  ;;  %p136_p1 = scmp.ne.s32.totalorder %s2682_s14, %s2678_s13 }
   0x7   : > { %p137_p2 = scmp.eq.s32.totalorder %s1989_s18, 3  ;;  %p142_p3 = scmp.ne.s32.totalorder %s2678_s13, %s2674_s12 }
   0x8   : > { %s3082_s20 = smov (%p37_p0, %s35_s20), 0  ;;  %p143_p5 = scmp.eq.s32.totalorder %s1990_s19, 3 }
   0x9   : > { %p2761_p4 = por %p137_p2, %p136_p1  ;;  %s121_s23 = ssub.s32 %s2690_s16, %s3082_s20 }
   0xa   : > { %p1995_p6 = scmp.ge.s32.totalorder %s2694_s17, 1  ;;  %p124_p7 = scmp.eq.s32.totalorder %s121_s23, 0 }
   0xb   : > { %p2768_p8 = por %p143_p5, %p142_p3  ;;  %p194_p9 = scmp.lt.s32.totalorder %s2694_s17, 5 }
   0xc   : > { %s2774_s25 = scalar_select %p124_p7, %s2682_s14, %s126_s21  }
   0xd   : > { %p195_p10 = pnand %p1995_p6, %p194_p9 }
   0xe   : > { %s1997_s5 = sshll.u32 (!%p195_p10), %s2686_s15, 6  ;;  %s231_s9 = sand.u32 (!%p195_p10), 1, %s2678_s13  }
   0xf   : > { %198 = sbr.rel (%p195_p10) target bundleno = 398 (0x18e), region = 32  ;;  %p236_p11 = scmp.lt.s32.totalorder (!%p195_p10), %s1997_s5, 255 }
  0x10   : > { %s1996_s10 = sshll.u32 (!%p195_p10), %s231_s9, 8  ;;  %s2241_s18 = sshll.u32 (!%p195_p10), %s2686_s15, 12 }
  0x11   : > { %s3017_s26 = scalar_lea.hbm (!%p195_p10), %s3073_s3, %s2241_s18  ;;  %s3025_s15 = scalar_lea.sflag (!%p195_p10), [#allocation4], %s231_s9 }
  0x12   : > { %s2698_s28 = smov (!%p195_p10), [#allocation3]  }
  0x13   : > { %s2622_s29 = sshll.u32 (!%p195_p10), %s2698_s28, 4  ;;  %s2623_s29 = int_to_ptr.vmem [resolvable:$false] %s2622_s29 }
  0x14   : > { %v2512_v0 = vld [vmem:[%s3071_s1 + $0x38] sm:$0xff]   ;;  %v2696_v1 = vmov 0   ;;  %v2513_v2 = vld [vmem:[%s3071_s1 + $0x30] sm:$0xff]   ;;  %v2514_v3 = vld [vmem:[%s3071_s1 + $0x28] sm:$0xff]   ;;  %s3084_s5 = smov (!%p236_p11, %s1997_s5), 255  ;;  %vm820_vm0 = vcmask 154624  }
  0x15   : > { %924 = vmatprep.subr.bf16.mxu0 %v2696_v1  ;;  %2433 = vmatprep.subr.bf16.mxu1 %v2696_v1  ;;  %v2515_v4 = vld [vmem:[%s3071_s1 + $0x20] sm:$0xff]   ;;  %s2176_s8 = sshll.u32 %s3084_s5, 3  ;;  %v2516_v5 = vld [vmem:[%s3071_s1 + $0x18] sm:$0xff]   ;;  %v2517_v8 = vld [vmem:[%s3071_s1 + $0x10] sm:$0xff]   ;;  %vm917_vm1 = vcmask 1040384   ;;  %vm918_vm2 = vcmask 1041408  }
  0x16   : > { %925 = vmatpush1.bf16.msra.mxu0 %v2512_v0  ;;  %2443 = vmatpush1.bf16.msra.mxu1 %v2512_v0  ;;  %s2792_s11 = scalar_lea.vmem %s3070_s0, %s2176_s8  ;;  %v2518_v9 = vld [vmem:[%s3071_s1 + $0x8] sm:$0xff]   ;;  %v2697_v10 = vmov 65535   ;;  %v2519_v12 = vld [vmem:[%s3071_s1] sm:$0xff]   ;;  %s2624_s30 = scalar_lea.vmem %s2623_s29, 8192 }
  0x17   : > { %926 = vmatprep.subr.bf16.mxu0 %v2696_v1  ;;  %2434 = vmatprep.subr.bf16.mxu1 %v2696_v1  ;;  %v2524_v6 = vld [vmem:[%s2792_s11 + $0x4] ss:$8 sps:$4 sm:$0xff]   ;;  %v919_v11 = vsel %vm917_vm1, 4294967295, %v2697_v10  ;;  %v2520_v13 = vld [vmem:[%s3071_s1 + $0x48] ss:$0 sps:$4 sm:$0x33]  }
  0x18   : > { %v2527_v7 = vld [vmem:[%s2792_s11 + $0x104] ss:$8 sps:$4 sm:$0xff]   ;;  %2074 = vmatprep.mubr.msk.bf16.mxu0 %vm820_vm0, %v2524_v6  ;;  %v920_v14 = vsel %vm918_vm2, %v919_v11, 0  ;;  %v2522_v17 = vld [vmem:[%s2792_s11] ss:$8 sps:$4 sm:$0xff]  }
  0x19   : > { %2090 = vmatprep.mubr.msk.bf16.mxu1 %vm820_vm0, %v2527_v7  ;;  %v922_v15 = vand.u32 %v2520_v13, %v920_v14  ;;  %v2521_v16 = vld [vmem:[%s3071_s1 + $0x40] sm:$0xff]   ;;  %v2528_v19 = vld [vmem:[%s2792_s11 + $0x14] ss:$8 sps:$4 sm:$0xff]   ;;  %v2532_v21 = vld [vmem:[%s2792_s11 + $0x10] ss:$8 sps:$4 sm:$0xff]  }
  0x1a   : > { %927 = vmatpush1.bf16.msra.mxu0 %v2513_v2  ;;  %2444 = vmatpush1.bf16.msra.mxu1 %v2513_v2  ;;  %v2525_v18 = vld [vmem:[%s2792_s11 + $0x100] ss:$8 sps:$4 sm:$0xff]   ;;  %v2530_v20 = vld [vmem:[%s2792_s11 + $0x114] ss:$8 sps:$4 sm:$0xff]   ;;  %v2533_v22 = vld [vmem:[%s2792_s11 + $0x110] ss:$8 sps:$4 sm:$0xff]  }
  0x1b   : > { %928 = vmatprep.subr.bf16.mxu0 %v2696_v1  ;;  %2435 = vmatprep.subr.bf16.mxu1 %v2696_v1  ;;  %v2534_v23 = vld [vmem:[%s2792_s11 + $0x24] ss:$8 sps:$4 sm:$0xff]   ;;  %v2538_v25 = vld [vmem:[%s2792_s11 + $0x20] ss:$8 sps:$4 sm:$0xff]   ;;  %v2540_v27 = vld [vmem:[%s2792_s11 + $0x34] ss:$8 sps:$4 sm:$0xff]  }
  0x1c   : > { %v2536_v24 = vld [vmem:[%s2792_s11 + $0x124] ss:$8 sps:$4 sm:$0xff]   ;;  %v2539_v26 = vld [vmem:[%s2792_s11 + $0x120] ss:$8 sps:$4 sm:$0xff]   ;;  %v2542_v28 = vld [vmem:[%s2792_s11 + $0x134] ss:$8 sps:$4 sm:$0xff]  }
  0x1d   : > { %v2544_v29 = vld [vmem:[%s2792_s11 + $0x30] ss:$8 sps:$4 sm:$0xff]   ;;  %v2546_v31 = vld [vmem:[%s2792_s11 + $0x44] ss:$8 sps:$4 sm:$0xff]   ;;  %v2550_v33 = vld [vmem:[%s2792_s11 + $0x40] ss:$8 sps:$4 sm:$0xff]  }
  0x1e   : > { %929 = vmatpush1.bf16.msra.mxu0 %v2514_v3  ;;  %2445 = vmatpush1.bf16.msra.mxu1 %v2514_v3  ;;  %v2545_v30 = vld [vmem:[%s2792_s11 + $0x130] ss:$8 sps:$4 sm:$0xff]   ;;  %v2548_v32 = vld [vmem:[%s2792_s11 + $0x144] ss:$8 sps:$4 sm:$0xff]   ;;  %v2551_v34 = vld [vmem:[%s2792_s11 + $0x140] ss:$8 sps:$4 sm:$0xff]  }
  0x1f   : > { %930 = vmatprep.subr.bf16.mxu0 %v2696_v1  ;;  %2436 = vmatprep.subr.bf16.mxu1 %v2696_v1  ;;  %v2552_v35 = vld [vmem:[%s2792_s11 + $0x54] ss:$8 sps:$4 sm:$0xff]   ;;  %v2556_v37 = vld [vmem:[%s2792_s11 + $0x50] ss:$8 sps:$4 sm:$0xff]   ;;  %v2558_v39 = vld [vmem:[%s2792_s11 + $0x64] ss:$8 sps:$4 sm:$0xff]  }
  0x20   : > { %v2554_v36 = vld [vmem:[%s2792_s11 + $0x154] ss:$8 sps:$4 sm:$0xff]   ;;  %v2557_v38 = vld [vmem:[%s2792_s11 + $0x150] ss:$8 sps:$4 sm:$0xff]   ;;  %v2560_v40 = vld [vmem:[%s2792_s11 + $0x164] ss:$8 sps:$4 sm:$0xff]  }
  0x21   : > { %v2562_v41 = vld [vmem:[%s2792_s11 + $0x60] ss:$8 sps:$4 sm:$0xff]   ;;  %v2564_v43 = vld [vmem:[%s2792_s11 + $0x74] ss:$8 sps:$4 sm:$0xff]   ;;  %v2568_v45 = vld [vmem:[%s2792_s11 + $0x70] ss:$8 sps:$4 sm:$0xff]  }
  0x22   : > { %931 = vmatpush1.bf16.msra.mxu0 %v2515_v4  ;;  %2446 = vmatpush1.bf16.msra.mxu1 %v2515_v4  ;;  %v2563_v42 = vld [vmem:[%s2792_s11 + $0x160] ss:$8 sps:$4 sm:$0xff]   ;;  %v2566_v44 = vld [vmem:[%s2792_s11 + $0x174] ss:$8 sps:$4 sm:$0xff]   ;;  %v2569_v46 = vld [vmem:[%s2792_s11 + $0x170] ss:$8 sps:$4 sm:$0xff]  }
  0x23   : > { %932 = vmatprep.subr.bf16.mxu0 %v2696_v1  ;;  %2437 = vmatprep.subr.bf16.mxu1 %v2696_v1  ;;  %v2570_v47 = vld [vmem:[%s2792_s11 + $0x84] ss:$8 sps:$4 sm:$0xff]   ;;  %v2574_v49 = vld [vmem:[%s2792_s11 + $0x80] ss:$8 sps:$4 sm:$0xff]   ;;  %v2576_v51 = vld [vmem:[%s2792_s11 + $0x94] ss:$8 sps:$4 sm:$0xff]  }
  0x24   : > { %v2572_v48 = vld [vmem:[%s2792_s11 + $0x184] ss:$8 sps:$4 sm:$0xff]   ;;  %v2575_v50 = vld [vmem:[%s2792_s11 + $0x180] ss:$8 sps:$4 sm:$0xff]   ;;  %v2578_v52 = vld [vmem:[%s2792_s11 + $0x194] ss:$8 sps:$4 sm:$0xff]  }
  0x25   : > { %v2580_v53 = vld [vmem:[%s2792_s11 + $0x90] ss:$8 sps:$4 sm:$0xff]   ;;  %v2582_v55 = vld [vmem:[%s2792_s11 + $0xa4] ss:$8 sps:$4 sm:$0xff]   ;;  %v2586_v57 = vld [vmem:[%s2792_s11 + $0xa0] ss:$8 sps:$4 sm:$0xff]  }
  0x26   : > { %933 = vmatpush1.bf16.msra.mxu0 %v2516_v5  ;;  %2447 = vmatpush1.bf16.msra.mxu1 %v2516_v5  ;;  %v2581_v54 = vld [vmem:[%s2792_s11 + $0x190] ss:$8 sps:$4 sm:$0xff]   ;;  %v2584_v56 = vld [vmem:[%s2792_s11 + $0x1a4] ss:$8 sps:$4 sm:$0xff]   ;;  %v2587_v58 = vld [vmem:[%s2792_s11 + $0x1a0] ss:$8 sps:$4 sm:$0xff]  }
  0x27   : > { %934 = vmatprep.subr.bf16.mxu0 %v2696_v1  ;;  %2438 = vmatprep.subr.bf16.mxu1 %v2696_v1  ;;  %v2588_v59 = vld [vmem:[%s2792_s11 + $0xb4] ss:$8 sps:$4 sm:$0xff]   ;;  %v2592_v61 = vld [vmem:[%s2792_s11 + $0xb0] ss:$8 sps:$4 sm:$0xff]   ;;  %v2594_v63 = vld [vmem:[%s2792_s11 + $0xc4] ss:$8 sps:$4 sm:$0xff]  }
  0x28   : > { %v2590_v60 = vld [vmem:[%s2792_s11 + $0x1b4] ss:$8 sps:$4 sm:$0xff]   ;;  %v2593_v62 = vld [vmem:[%s2792_s11 + $0x1b0] ss:$8 sps:$4 sm:$0xff]   ;;  %v2596_v0 = vld [vmem:[%s2792_s11 + $0x1c4] ss:$8 sps:$4 sm:$0xff]  }
  0x29   : > { %v2599_v2 = vld [vmem:[%s2792_s11 + $0x1c0] ss:$8 sps:$4 sm:$0xff]   ;;  %v2600_v3 = vld [vmem:[%s2792_s11 + $0xd4] ss:$8 sps:$4 sm:$0xff]   ;;  %v2604_v5 = vld [vmem:[%s2792_s11 + $0xd0] ss:$8 sps:$4 sm:$0xff]  }
  0x2a   : > { %935 = vmatpush1.bf16.msra.mxu0 %v2517_v8  ;;  %2448 = vmatpush1.bf16.msra.mxu1 %v2517_v8  ;;  %v2602_v4 = vld [vmem:[%s2792_s11 + $0x1d4] ss:$8 sps:$4 sm:$0xff]   ;;  %v2605_v6 = vld [vmem:[%s2792_s11 + $0x1d0] ss:$8 sps:$4 sm:$0xff]   ;;  %v2606_v7 = vld [vmem:[%s2792_s11 + $0xe4] ss:$8 sps:$4 sm:$0xff]  }
  0x2b   : > { %936 = vmatprep.subr.bf16.mxu0 %v2696_v1  ;;  %2439 = vmatprep.subr.bf16.mxu1 %v2696_v1  ;;  %v2608_v8 = vld [vmem:[%s2792_s11 + $0x1e4] ss:$8 sps:$4 sm:$0xff]   ;;  %v2611_v10 = vld [vmem:[%s2792_s11 + $0x1e0] ss:$8 sps:$4 sm:$0xff]   ;;  %v2612_v11 = vld [vmem:[%s2792_s11 + $0xf4] ss:$8 sps:$4 sm:$0xff]  }
  0x2c   : > { %v2616_v13 = vld [vmem:[%s2792_s11 + $0xf0] ss:$8 sps:$4 sm:$0xff]  }
  0x2d   : > { %v2617_v14 = vld [vmem:[%s2792_s11 + $0x1f0] ss:$8 sps:$4 sm:$0xff]  }
  0x2e   : > { %937 = vmatpush1.bf16.msra.mxu0 %v2518_v9  ;;  %2449 = vmatpush1.bf16.msra.mxu1 %v2518_v9  ;;  %v2610_v9 = vld [vmem:[%s2792_s11 + $0xe0] ss:$8 sps:$4 sm:$0xff]  }
  0x2f   : > { %938 = vmatprep.subr.bf16.mxu0 %v2696_v1  ;;  %2440 = vmatprep.subr.bf16.mxu1 %v2696_v1 }
  0x32   : > { %939 = vmatpush1.bf16.msra.mxu0 %v2519_v12  ;;  %2450 = vmatpush1.bf16.msra.mxu1 %v2519_v12  ;;  %v2614_v12 = vld [vmem:[%s2792_s11 + $0x1f4] ss:$8 sps:$4 sm:$0xff]  }
  0x33   : > { %952 = vmatprep.subr.bf16.mxu0 %v2696_v1  ;;  %2441 = vmatprep.subr.bf16.mxu1 %v2696_v1 }
  0x36   : > { %953 = vmatpush2.bf16.msra.mxu0 %v922_v15  ;;  %2451 = vmatpush2.bf16.msra.mxu1 %v922_v15 }
  0x37   : > { %954 = vmatprep.subr.bf16.mxu0 %v2696_v1  ;;  %2442 = vmatprep.subr.bf16.mxu1 %v2696_v1  ;;  %v2598_v1 = vld [vmem:[%s2792_s11 + $0xc0] ss:$8 sps:$4 sm:$0xff]   ;;  %s2920_s11 = scalar_lea.vmem [#allocation3], %s1996_s10 }
  0x38   : > { %s1878_s19 = sshll.u32 %s2920_s11, 4  ;;  %s3019_s19 = int_to_ptr.vmem [resolvable:$true] %s1878_s19 }
  0x39   : > { %s2618_s27 = scalar_lea.vmem %s3019_s19, 4096  ;;  %p2625_p1 = scmp.lt.s32.totalorder %s3019_s19, %s2623_s29 }
  0x3a   : > { %955 = vmatpush2.bf16.msra.mxu0 %v2521_v16  ;;  %2452 = vmatpush2.bf16.msra.mxu1 %v2521_v16  ;;  %v2911_v16 = vld [vmem:[%s3072_s2] ss:$0 sm:$0xff]  ;;  %p2619_p12 = scmp.ne.s32.totalorder %s3019_s19, %s2618_s27  ;;  %p2626_p2 = scmp.lt.s32.totalorder %s2624_s30, %s2618_s27 }
  0x3c   : > { %p2620_p13 = pnand %p2619_p12, %p2761_p4  ;;  %p2627_p3 = por %p2626_p2, %p2625_p1 }
  0x3d   : > { %957 = vmatmul.mubr.bf16.vlgmr.msra.gmra.mxu0 %v2522_v17  ;;  %1085 = vmatmul.mubr.bf16.vlgmr.msra.gmra.mxu1 %v2525_v18 }
  0x3e   : > { %2075 = vmatprep.mubr.msk.bf16.mxu0 %vm820_vm0, %v2528_v19  ;;  %2091 = vmatprep.mubr.msk.bf16.mxu1 %vm820_vm0, %v2530_v20  ;;  %p2621_p0 = pneg %p2620_p13 }
  0x40   : > { %p2628_p5 = pnand %p2627_p3, %p2621_p0 }
  0x45   : > { %965 = vmatmul.mubr.bf16.gmra.mxu0 %v2532_v21  ;;  %1093 = vmatmul.mubr.bf16.gmra.mxu1 %v2533_v22 }
  0x46   : > { %2076 = vmatprep.mubr.msk.bf16.mxu0 %vm820_vm0, %v2534_v23  ;;  %2092 = vmatprep.mubr.msk.bf16.mxu1 %vm820_vm0, %v2536_v24 }
  0x4d   : > { %973 = vmatmul.mubr.bf16.gmra.mxu0 %v2538_v25  ;;  %1101 = vmatmul.mubr.bf16.gmra.mxu1 %v2539_v26 }
  0x4e   : > { %2077 = vmatprep.mubr.msk.bf16.mxu0 %vm820_vm0, %v2540_v27  ;;  %2093 = vmatprep.mubr.msk.bf16.mxu1 %vm820_vm0, %v2542_v28 }
  0x55   : > { %981 = vmatmul.mubr.bf16.gmra.mxu0 %v2544_v29  ;;  %1109 = vmatmul.mubr.bf16.gmra.mxu1 %v2545_v30 }
  0x56   : > { %2078 = vmatprep.mubr.msk.bf16.mxu0 %vm820_vm0, %v2546_v31  ;;  %2094 = vmatprep.mubr.msk.bf16.mxu1 %vm820_vm0, %v2548_v32 }
  0x5d   : > { %989 = vmatmul.mubr.bf16.gmra.mxu0 %v2550_v33  ;;  %1117 = vmatmul.mubr.bf16.gmra.mxu1 %v2551_v34 }
  0x5e   : > { %2079 = vmatprep.mubr.msk.bf16.mxu0 %vm820_vm0, %v2552_v35  ;;  %2095 = vmatprep.mubr.msk.bf16.mxu1 %vm820_vm0, %v2554_v36 }
  0x65   : > { %997 = vmatmul.mubr.bf16.gmra.mxu0 %v2556_v37  ;;  %1125 = vmatmul.mubr.bf16.gmra.mxu1 %v2557_v38 }
  0x66   : > { %2080 = vmatprep.mubr.msk.bf16.mxu0 %vm820_vm0, %v2558_v39  ;;  %2096 = vmatprep.mubr.msk.bf16.mxu1 %vm820_vm0, %v2560_v40 }
  0x6d   : > { %1005 = vmatmul.mubr.bf16.gmra.mxu0 %v2562_v41  ;;  %1133 = vmatmul.mubr.bf16.gmra.mxu1 %v2563_v42 }
  0x6e   : > { %2081 = vmatprep.mubr.msk.bf16.mxu0 %vm820_vm0, %v2564_v43  ;;  %2097 = vmatprep.mubr.msk.bf16.mxu1 %vm820_vm0, %v2566_v44 }
  0x75   : > { %1013 = vmatmul.mubr.bf16.gmra.mxu0 %v2568_v45  ;;  %1141 = vmatmul.mubr.bf16.gmra.mxu1 %v2569_v46 }
  0x76   : > { %2082 = vmatprep.mubr.msk.bf16.mxu0 %vm820_vm0, %v2570_v47  ;;  %2098 = vmatprep.mubr.msk.bf16.mxu1 %vm820_vm0, %v2572_v48 }
  0x7d   : > { %1021 = vmatmul.mubr.bf16.gmra.mxu0 %v2574_v49  ;;  %1149 = vmatmul.mubr.bf16.gmra.mxu1 %v2575_v50 }
  0x7e   : > { %2083 = vmatprep.mubr.msk.bf16.mxu0 %vm820_vm0, %v2576_v51  ;;  %2099 = vmatprep.mubr.msk.bf16.mxu1 %vm820_vm0, %v2578_v52 }
  0x85   : > { %1029 = vmatmul.mubr.bf16.gmra.mxu0 %v2580_v53  ;;  %1157 = vmatmul.mubr.bf16.gmra.mxu1 %v2581_v54 }
  0x86   : > { %2084 = vmatprep.mubr.msk.bf16.mxu0 %vm820_vm0, %v2582_v55  ;;  %2100 = vmatprep.mubr.msk.bf16.mxu1 %vm820_vm0, %v2584_v56 }
  0x8d   : > { %1037 = vmatmul.mubr.bf16.gmra.mxu0 %v2586_v57  ;;  %1165 = vmatmul.mubr.bf16.gmra.mxu1 %v2587_v58 }
  0x8e   : > { %2085 = vmatprep.mubr.msk.bf16.mxu0 %vm820_vm0, %v2588_v59  ;;  %2101 = vmatprep.mubr.msk.bf16.mxu1 %vm820_vm0, %v2590_v60 }
  0x95   : > { %1045 = vmatmul.mubr.bf16.gmra.mxu0 %v2592_v61  ;;  %1173 = vmatmul.mubr.bf16.gmra.mxu1 %v2593_v62 }
  0x96   : > { %2086 = vmatprep.mubr.msk.bf16.mxu0 %vm820_vm0, %v2594_v63  ;;  %2102 = vmatprep.mubr.msk.bf16.mxu1 %vm820_vm0, %v2596_v0 }
  0x9d   : > { %1053 = vmatmul.mubr.bf16.gmra.mxu0 %v2598_v1  ;;  %1181 = vmatmul.mubr.bf16.gmra.mxu1 %v2599_v2 }
  0x9e   : > { %2087 = vmatprep.mubr.msk.bf16.mxu0 %vm820_vm0, %v2600_v3  ;;  %2103 = vmatprep.mubr.msk.bf16.mxu1 %vm820_vm0, %v2602_v4 }
  0xa5   : > { %1061 = vmatmul.mubr.bf16.gmra.mxu0 %v2604_v5  ;;  %1189 = vmatmul.mubr.bf16.gmra.mxu1 %v2605_v6 }
  0xa6   : > { %2088 = vmatprep.mubr.msk.bf16.mxu0 %vm820_vm0, %v2606_v7  ;;  %2104 = vmatprep.mubr.msk.bf16.mxu1 %vm820_vm0, %v2608_v8 }
  0xad   : > { %1069 = vmatmul.mubr.bf16.gmra.mxu0 %v2610_v9  ;;  %1197 = vmatmul.mubr.bf16.gmra.mxu1 %v2611_v10 }
  0xae   : > { %2089 = vmatprep.mubr.msk.bf16.mxu0 %vm820_vm0, %v2612_v11  ;;  %2105 = vmatprep.mubr.msk.bf16.mxu1 %vm820_vm0, %v2614_v12 }
  0xb5   : > { %1077 = vmatmul.mubr.bf16.gmra.mxu0 %v2616_v13  ;;  %1205 = vmatmul.mubr.bf16.gmra.mxu1 %v2617_v14 }
  0xfd   : > { %v958_v15 = vpop.f32.mrf.mxu0  ;;  %v1086_v17 = vpop.f32.mrf.mxu1 }
  0xfe   : > { %v1415_v20 = vadd.f32 %v2911_v16, %v958_v15  ;;  %v1447_v21 = vadd.f32 %v2911_v16, %v1086_v17 }
  0xff   : > { %v960_v18 = vpop.f32.mrf.mxu0  ;;  %v1088_v19 = vpop.f32.mrf.mxu1 }
 0x100   : > { %v1479_v28 = vmax.f32 %v1415_v20, 0.0  ;;  %v1511_v29 = vmax.f32 %v1447_v21, 0.0 }
 0x101   : > { %v961_v22 = vpop.f32.mrf.mxu0  ;;  %v1089_v23 = vpop.f32.mrf.mxu1 }
 0x102   : > { %v1416_v24 = vadd.f32 %v2911_v16, %v961_v22  ;;  %v1448_v25 = vadd.f32 %v2911_v16, %v1089_v23 }
 0x103   : > { %v963_v26 = vpop.f32.mrf.mxu0  ;;  %v1091_v27 = vpop.f32.mrf.mxu1 }
 0x104   : > { %v1480_v30 = vmax.f32 %v1416_v24, 0.0  ;;  %v1512_v31 = vmax.f32 %v1448_v25, 0.0 }
 0x105   : > { %v966_v32 = vpop.f32.mrf.mxu0  ;;  %v1094_v33 = vpop.f32.mrf.mxu1 }
 0x106   : > { %v2245_v34 = vpack.c.bf16 %v1480_v30, %v1479_v28  ;;  %v2325_v35 = vpack.c.bf16 %v1512_v31, %v1511_v29  ;;  %v1417_v38 = vadd.f32 %v2911_v16, %v966_v32  ;;  %v1449_v39 = vadd.f32 %v2911_v16, %v1094_v33 }
 0x107   : > { %v968_v36 = vpop.f32.mrf.mxu0  ;;  %v1096_v37 = vpop.f32.mrf.mxu1 }
 0x108   : > { %2246 = vst [vmem:[%s2920_s11] sm:$0xff] %v2245_v34   ;;  %2417 = vst [vmem:[%s2920_s11 + $0x80] sm:$0xff] %v2325_v35   ;;  %v1481_v46 = vmax.f32 %v1417_v38, 0.0  ;;  %v1513_v47 = vmax.f32 %v1449_v39, 0.0 }
 0x109   : > { %v969_v40 = vpop.f32.mrf.mxu0  ;;  %v1097_v41 = vpop.f32.mrf.mxu1 }
 0x10a   : > { %v1418_v42 = vadd.f32 %v2911_v16, %v969_v40  ;;  %v1450_v43 = vadd.f32 %v2911_v16, %v1097_v41 }
 0x10b   : > { %v971_v44 = vpop.f32.mrf.mxu0  ;;  %v1099_v45 = vpop.f32.mrf.mxu1 }
 0x10c   : > { %v1482_v48 = vmax.f32 %v1418_v42, 0.0  ;;  %v1514_v49 = vmax.f32 %v1450_v43, 0.0 }
 0x10d   : > { %v974_v50 = vpop.f32.mrf.mxu0  ;;  %v1102_v51 = vpop.f32.mrf.mxu1 }
 0x10e   : > { %v2250_v52 = vpack.c.bf16 %v1482_v48, %v1481_v46  ;;  %v2330_v53 = vpack.c.bf16 %v1514_v49, %v1513_v47  ;;  %v1419_v56 = vadd.f32 %v2911_v16, %v974_v50  ;;  %v1451_v57 = vadd.f32 %v2911_v16, %v1102_v51 }
 0x10f   : > { %v976_v54 = vpop.f32.mrf.mxu0  ;;  %v1104_v55 = vpop.f32.mrf.mxu1 }
 0x110   : > { %2402 = vst [vmem:[%s2920_s11 + $0x8] sm:$0xff] %v2250_v52   ;;  %2418 = vst [vmem:[%s2920_s11 + $0x88] sm:$0xff] %v2330_v53   ;;  %v1483_v0 = vmax.f32 %v1419_v56, 0.0  ;;  %v1515_v1 = vmax.f32 %v1451_v57, 0.0 }
 0x111   : > { %v977_v58 = vpop.f32.mrf.mxu0  ;;  %v1105_v59 = vpop.f32.mrf.mxu1 }
 0x112   : > { %v1420_v60 = vadd.f32 %v2911_v16, %v977_v58  ;;  %v1452_v61 = vadd.f32 %v2911_v16, %v1105_v59 }
 0x113   : > { %v979_v62 = vpop.f32.mrf.mxu0  ;;  %v1107_v63 = vpop.f32.mrf.mxu1 }
 0x114   : > { %v1484_v2 = vmax.f32 %v1420_v60, 0.0  ;;  %v1516_v3 = vmax.f32 %v1452_v61, 0.0 }
 0x115   : > { %v982_v4 = vpop.f32.mrf.mxu0  ;;  %v1110_v5 = vpop.f32.mrf.mxu1 }
 0x116   : > { %v2255_v6 = vpack.c.bf16 %v1484_v2, %v1483_v0  ;;  %v2335_v7 = vpack.c.bf16 %v1516_v3, %v1515_v1  ;;  %v1421_v10 = vadd.f32 %v2911_v16, %v982_v4  ;;  %v1453_v11 = vadd.f32 %v2911_v16, %v1110_v5 }
 0x117   : > { %v984_v8 = vpop.f32.mrf.mxu0  ;;  %v1112_v9 = vpop.f32.mrf.mxu1 }
 0x118   : > { %2403 = vst [vmem:[%s2920_s11 + $0x10] sm:$0xff] %v2255_v6   ;;  %2419 = vst [vmem:[%s2920_s11 + $0x90] sm:$0xff] %v2335_v7   ;;  %v1485_v19 = vmax.f32 %v1421_v10, 0.0  ;;  %v1517_v20 = vmax.f32 %v1453_v11, 0.0 }
 0x119   : > { %v985_v12 = vpop.f32.mrf.mxu0  ;;  %v1113_v13 = vpop.f32.mrf.mxu1 }
 0x11a   : > { %v1422_v14 = vadd.f32 %v2911_v16, %v985_v12  ;;  %v1454_v15 = vadd.f32 %v2911_v16, %v1113_v13 }
 0x11b   : > { %v987_v17 = vpop.f32.mrf.mxu0  ;;  %v1115_v18 = vpop.f32.mrf.mxu1 }
 0x11c   : > { %v1486_v21 = vmax.f32 %v1422_v14, 0.0  ;;  %v1518_v22 = vmax.f32 %v1454_v15, 0.0 }
 0x11d   : > { %v990_v23 = vpop.f32.mrf.mxu0  ;;  %v1118_v24 = vpop.f32.mrf.mxu1 }
 0x11e   : > { %v2260_v25 = vpack.c.bf16 %v1486_v21, %v1485_v19  ;;  %v2340_v26 = vpack.c.bf16 %v1518_v22, %v1517_v20  ;;  %v1423_v29 = vadd.f32 %v2911_v16, %v990_v23  ;;  %v1455_v30 = vadd.f32 %v2911_v16, %v1118_v24 }
 0x11f   : > { %v992_v27 = vpop.f32.mrf.mxu0  ;;  %v1120_v28 = vpop.f32.mrf.mxu1 }
 0x120   : > { %2404 = vst [vmem:[%s2920_s11 + $0x18] sm:$0xff] %v2260_v25   ;;  %2420 = vst [vmem:[%s2920_s11 + $0x98] sm:$0xff] %v2340_v26   ;;  %v1487_v37 = vmax.f32 %v1423_v29, 0.0  ;;  %v1519_v38 = vmax.f32 %v1455_v30, 0.0 }
 0x121   : > { %v993_v31 = vpop.f32.mrf.mxu0  ;;  %v1121_v32 = vpop.f32.mrf.mxu1 }
 0x122   : > { %v1424_v33 = vadd.f32 %v2911_v16, %v993_v31  ;;  %v1456_v34 = vadd.f32 %v2911_v16, %v1121_v32 }
 0x123   : > { %v995_v35 = vpop.f32.mrf.mxu0  ;;  %v1123_v36 = vpop.f32.mrf.mxu1 }
 0x124   : > { %v1488_v39 = vmax.f32 %v1424_v33, 0.0  ;;  %v1520_v40 = vmax.f32 %v1456_v34, 0.0 }
 0x125   : > { %v998_v41 = vpop.f32.mrf.mxu0  ;;  %v1126_v42 = vpop.f32.mrf.mxu1 }
 0x126   : > { %v2265_v43 = vpack.c.bf16 %v1488_v39, %v1487_v37  ;;  %v2345_v44 = vpack.c.bf16 %v1520_v40, %v1519_v38  ;;  %v1425_v47 = vadd.f32 %v2911_v16, %v998_v41  ;;  %v1457_v48 = vadd.f32 %v2911_v16, %v1126_v42 }
 0x127   : > { %v1000_v45 = vpop.f32.mrf.mxu0  ;;  %v1128_v46 = vpop.f32.mrf.mxu1 }
 0x128   : > { %2405 = vst [vmem:[%s2920_s11 + $0x20] sm:$0xff] %v2265_v43   ;;  %2421 = vst [vmem:[%s2920_s11 + $0xa0] sm:$0xff] %v2345_v44   ;;  %v1489_v55 = vmax.f32 %v1425_v47, 0.0  ;;  %v1521_v56 = vmax.f32 %v1457_v48, 0.0 }
 0x129   : > { %v1001_v49 = vpop.f32.mrf.mxu0  ;;  %v1129_v50 = vpop.f32.mrf.mxu1 }
 0x12a   : > { %v1426_v51 = vadd.f32 %v2911_v16, %v1001_v49  ;;  %v1458_v52 = vadd.f32 %v2911_v16, %v1129_v50 }
 0x12b   : > { %v1003_v53 = vpop.f32.mrf.mxu0  ;;  %v1131_v54 = vpop.f32.mrf.mxu1 }
 0x12c   : > { %v1490_v57 = vmax.f32 %v1426_v51, 0.0  ;;  %v1522_v58 = vmax.f32 %v1458_v52, 0.0 }
 0x12d   : > { %v1006_v59 = vpop.f32.mrf.mxu0  ;;  %v1134_v60 = vpop.f32.mrf.mxu1 }
 0x12e   : > { %v2270_v61 = vpack.c.bf16 %v1490_v57, %v1489_v55  ;;  %v2350_v62 = vpack.c.bf16 %v1522_v58, %v1521_v56  ;;  %v1427_v1 = vadd.f32 %v2911_v16, %v1006_v59  ;;  %v1459_v2 = vadd.f32 %v2911_v16, %v1134_v60 }
 0x12f   : > { %v1008_v63 = vpop.f32.mrf.mxu0  ;;  %v1136_v0 = vpop.f32.mrf.mxu1 }
 0x130   : > { %2406 = vst [vmem:[%s2920_s11 + $0x28] sm:$0xff] %v2270_v61   ;;  %2422 = vst [vmem:[%s2920_s11 + $0xa8] sm:$0xff] %v2350_v62   ;;  %v1491_v9 = vmax.f32 %v1427_v1, 0.0  ;;  %v1523_v10 = vmax.f32 %v1459_v2, 0.0 }
 0x131   : > { %v1009_v3 = vpop.f32.mrf.mxu0  ;;  %v1137_v4 = vpop.f32.mrf.mxu1 }
 0x132   : > { %v1428_v5 = vadd.f32 %v2911_v16, %v1009_v3  ;;  %v1460_v6 = vadd.f32 %v2911_v16, %v1137_v4 }
 0x133   : > { %v1011_v7 = vpop.f32.mrf.mxu0  ;;  %v1139_v8 = vpop.f32.mrf.mxu1 }
 0x134   : > { %v1492_v11 = vmax.f32 %v1428_v5, 0.0  ;;  %v1524_v12 = vmax.f32 %v1460_v6, 0.0 }
 0x135   : > { %v1014_v13 = vpop.f32.mrf.mxu0  ;;  %v1142_v14 = vpop.f32.mrf.mxu1 }
 0x136   : > { %v2275_v15 = vpack.c.bf16 %v1492_v11, %v1491_v9  ;;  %v2355_v17 = vpack.c.bf16 %v1524_v12, %v1523_v10  ;;  %v1429_v20 = vadd.f32 %v2911_v16, %v1014_v13  ;;  %v1461_v21 = vadd.f32 %v2911_v16, %v1142_v14 }
 0x137   : > { %v1016_v18 = vpop.f32.mrf.mxu0  ;;  %v1144_v19 = vpop.f32.mrf.mxu1 }
 0x138   : > { %2407 = vst [vmem:[%s2920_s11 + $0x30] sm:$0xff] %v2275_v15   ;;  %2423 = vst [vmem:[%s2920_s11 + $0xb0] sm:$0xff] %v2355_v17   ;;  %v1493_v28 = vmax.f32 %v1429_v20, 0.0  ;;  %v1525_v29 = vmax.f32 %v1461_v21, 0.0 }
 0x139   : > { %v1017_v22 = vpop.f32.mrf.mxu0  ;;  %v1145_v23 = vpop.f32.mrf.mxu1 }
 0x13a   : > { %v1430_v24 = vadd.f32 %v2911_v16, %v1017_v22  ;;  %v1462_v25 = vadd.f32 %v2911_v16, %v1145_v23 }
 0x13b   : > { %v1019_v26 = vpop.f32.mrf.mxu0  ;;  %v1147_v27 = vpop.f32.mrf.mxu1 }
 0x13c   : > { %v1494_v30 = vmax.f32 %v1430_v24, 0.0  ;;  %v1526_v31 = vmax.f32 %v1462_v25, 0.0 }
 0x13d   : > { %v1022_v32 = vpop.f32.mrf.mxu0  ;;  %v1150_v33 = vpop.f32.mrf.mxu1 }
 0x13e   : > { %v2280_v34 = vpack.c.bf16 %v1494_v30, %v1493_v28  ;;  %v2360_v35 = vpack.c.bf16 %v1526_v31, %v1525_v29  ;;  %v1431_v38 = vadd.f32 %v2911_v16, %v1022_v32  ;;  %v1463_v39 = vadd.f32 %v2911_v16, %v1150_v33 }
 0x13f   : > { %v1024_v36 = vpop.f32.mrf.mxu0  ;;  %v1152_v37 = vpop.f32.mrf.mxu1 }
 0x140   : > { %2408 = vst [vmem:[%s2920_s11 + $0x38] sm:$0xff] %v2280_v34   ;;  %2424 = vst [vmem:[%s2920_s11 + $0xb8] sm:$0xff] %v2360_v35   ;;  %v1495_v46 = vmax.f32 %v1431_v38, 0.0  ;;  %v1527_v47 = vmax.f32 %v1463_v39, 0.0 }
 0x141   : > { %v1025_v40 = vpop.f32.mrf.mxu0  ;;  %v1153_v41 = vpop.f32.mrf.mxu1 }
 0x142   : > { %v1432_v42 = vadd.f32 %v2911_v16, %v1025_v40  ;;  %v1464_v43 = vadd.f32 %v2911_v16, %v1153_v41 }
 0x143   : > { %v1027_v44 = vpop.f32.mrf.mxu0  ;;  %v1155_v45 = vpop.f32.mrf.mxu1 }
 0x144   : > { %v1496_v48 = vmax.f32 %v1432_v42, 0.0  ;;  %v1528_v49 = vmax.f32 %v1464_v43, 0.0 }
 0x145   : > { %v1030_v50 = vpop.f32.mrf.mxu0  ;;  %v1158_v51 = vpop.f32.mrf.mxu1 }
 0x146   : > { %v2285_v52 = vpack.c.bf16 %v1496_v48, %v1495_v46  ;;  %v2365_v53 = vpack.c.bf16 %v1528_v49, %v1527_v47  ;;  %v1433_v56 = vadd.f32 %v2911_v16, %v1030_v50  ;;  %v1465_v57 = vadd.f32 %v2911_v16, %v1158_v51 }
 0x147   : > { %v1032_v54 = vpop.f32.mrf.mxu0  ;;  %v1160_v55 = vpop.f32.mrf.mxu1 }
 0x148   : > { %2409 = vst [vmem:[%s2920_s11 + $0x40] sm:$0xff] %v2285_v52   ;;  %2425 = vst [vmem:[%s2920_s11 + $0xc0] sm:$0xff] %v2365_v53   ;;  %v1497_v0 = vmax.f32 %v1433_v56, 0.0  ;;  %v1529_v1 = vmax.f32 %v1465_v57, 0.0 }
 0x149   : > { %v1033_v58 = vpop.f32.mrf.mxu0  ;;  %v1161_v59 = vpop.f32.mrf.mxu1 }
 0x14a   : > { %v1434_v60 = vadd.f32 %v2911_v16, %v1033_v58  ;;  %v1466_v61 = vadd.f32 %v2911_v16, %v1161_v59 }
 0x14b   : > { %v1035_v62 = vpop.f32.mrf.mxu0  ;;  %v1163_v63 = vpop.f32.mrf.mxu1 }
 0x14c   : > { %v1498_v2 = vmax.f32 %v1434_v60, 0.0  ;;  %v1530_v3 = vmax.f32 %v1466_v61, 0.0 }
 0x14d   : > { %v1038_v4 = vpop.f32.mrf.mxu0  ;;  %v1166_v5 = vpop.f32.mrf.mxu1 }
 0x14e   : > { %v2290_v6 = vpack.c.bf16 %v1498_v2, %v1497_v0  ;;  %v2370_v7 = vpack.c.bf16 %v1530_v3, %v1529_v1  ;;  %v1435_v10 = vadd.f32 %v2911_v16, %v1038_v4  ;;  %v1467_v11 = vadd.f32 %v2911_v16, %v1166_v5 }
 0x14f   : > { %v1040_v8 = vpop.f32.mrf.mxu0  ;;  %v1168_v9 = vpop.f32.mrf.mxu1 }
 0x150   : > { %2410 = vst [vmem:[%s2920_s11 + $0x48] sm:$0xff] %v2290_v6   ;;  %2426 = vst [vmem:[%s2920_s11 + $0xc8] sm:$0xff] %v2370_v7   ;;  %v1499_v19 = vmax.f32 %v1435_v10, 0.0  ;;  %v1531_v20 = vmax.f32 %v1467_v11, 0.0 }
 0x151   : > { %v1041_v12 = vpop.f32.mrf.mxu0  ;;  %v1169_v13 = vpop.f32.mrf.mxu1 }
 0x152   : > { %v1436_v14 = vadd.f32 %v2911_v16, %v1041_v12  ;;  %v1468_v15 = vadd.f32 %v2911_v16, %v1169_v13 }
 0x153   : > { %v1043_v17 = vpop.f32.mrf.mxu0  ;;  %v1171_v18 = vpop.f32.mrf.mxu1 }
 0x154   : > { %v1500_v21 = vmax.f32 %v1436_v14, 0.0  ;;  %v1532_v22 = vmax.f32 %v1468_v15, 0.0 }
 0x155   : > { %v1046_v23 = vpop.f32.mrf.mxu0  ;;  %v1174_v24 = vpop.f32.mrf.mxu1 }
 0x156   : > { %v2295_v25 = vpack.c.bf16 %v1500_v21, %v1499_v19  ;;  %v2375_v26 = vpack.c.bf16 %v1532_v22, %v1531_v20  ;;  %v1437_v29 = vadd.f32 %v2911_v16, %v1046_v23  ;;  %v1469_v30 = vadd.f32 %v2911_v16, %v1174_v24 }
 0x157   : > { %v1048_v27 = vpop.f32.mrf.mxu0  ;;  %v1176_v28 = vpop.f32.mrf.mxu1 }
 0x158   : > { %2411 = vst [vmem:[%s2920_s11 + $0x50] sm:$0xff] %v2295_v25   ;;  %2427 = vst [vmem:[%s2920_s11 + $0xd0] sm:$0xff] %v2375_v26   ;;  %v1501_v37 = vmax.f32 %v1437_v29, 0.0  ;;  %v1533_v38 = vmax.f32 %v1469_v30, 0.0 }
 0x159   : > { %v1049_v31 = vpop.f32.mrf.mxu0  ;;  %v1177_v32 = vpop.f32.mrf.mxu1 }
 0x15a   : > { %v1438_v33 = vadd.f32 %v2911_v16, %v1049_v31  ;;  %v1470_v34 = vadd.f32 %v2911_v16, %v1177_v32 }
 0x15b   : > { %v1051_v35 = vpop.f32.mrf.mxu0  ;;  %v1179_v36 = vpop.f32.mrf.mxu1 }
 0x15c   : > { %v1502_v39 = vmax.f32 %v1438_v33, 0.0  ;;  %v1534_v40 = vmax.f32 %v1470_v34, 0.0 }
 0x15d   : > { %v1054_v41 = vpop.f32.mrf.mxu0  ;;  %v1182_v42 = vpop.f32.mrf.mxu1 }
 0x15e   : > { %v2300_v43 = vpack.c.bf16 %v1502_v39, %v1501_v37  ;;  %v2380_v44 = vpack.c.bf16 %v1534_v40, %v1533_v38  ;;  %v1439_v47 = vadd.f32 %v2911_v16, %v1054_v41  ;;  %v1471_v48 = vadd.f32 %v2911_v16, %v1182_v42 }
 0x15f   : > { %v1056_v45 = vpop.f32.mrf.mxu0  ;;  %v1184_v46 = vpop.f32.mrf.mxu1 }
 0x160   : > { %2412 = vst [vmem:[%s2920_s11 + $0x58] sm:$0xff] %v2300_v43   ;;  %2428 = vst [vmem:[%s2920_s11 + $0xd8] sm:$0xff] %v2380_v44   ;;  %v1503_v55 = vmax.f32 %v1439_v47, 0.0  ;;  %v1535_v56 = vmax.f32 %v1471_v48, 0.0 }
 0x161   : > { %v1057_v49 = vpop.f32.mrf.mxu0  ;;  %v1185_v50 = vpop.f32.mrf.mxu1 }
 0x162   : > { %v1440_v51 = vadd.f32 %v2911_v16, %v1057_v49  ;;  %v1472_v52 = vadd.f32 %v2911_v16, %v1185_v50 }
 0x163   : > { %v1059_v53 = vpop.f32.mrf.mxu0  ;;  %v1187_v54 = vpop.f32.mrf.mxu1 }
 0x164   : > { %v1504_v57 = vmax.f32 %v1440_v51, 0.0  ;;  %v1536_v58 = vmax.f32 %v1472_v52, 0.0 }
 0x165   : > { %v1062_v59 = vpop.f32.mrf.mxu0  ;;  %v1190_v60 = vpop.f32.mrf.mxu1 }
 0x166   : > { %v2305_v61 = vpack.c.bf16 %v1504_v57, %v1503_v55  ;;  %v2385_v62 = vpack.c.bf16 %v1536_v58, %v1535_v56  ;;  %v1441_v1 = vadd.f32 %v2911_v16, %v1062_v59  ;;  %v1473_v2 = vadd.f32 %v2911_v16, %v1190_v60 }
 0x167   : > { %v1064_v63 = vpop.f32.mrf.mxu0  ;;  %v1192_v0 = vpop.f32.mrf.mxu1 }
 0x168   : > { %2413 = vst [vmem:[%s2920_s11 + $0x60] sm:$0xff] %v2305_v61   ;;  %2429 = vst [vmem:[%s2920_s11 + $0xe0] sm:$0xff] %v2385_v62   ;;  %v1505_v9 = vmax.f32 %v1441_v1, 0.0  ;;  %v1537_v10 = vmax.f32 %v1473_v2, 0.0 }
 0x169   : > { %v1065_v3 = vpop.f32.mrf.mxu0  ;;  %v1193_v4 = vpop.f32.mrf.mxu1 }
 0x16a   : > { %v1442_v5 = vadd.f32 %v2911_v16, %v1065_v3  ;;  %v1474_v6 = vadd.f32 %v2911_v16, %v1193_v4 }
 0x16b   : > { %v1067_v7 = vpop.f32.mrf.mxu0  ;;  %v1195_v8 = vpop.f32.mrf.mxu1 }
 0x16c   : > { %v1506_v11 = vmax.f32 %v1442_v5, 0.0  ;;  %v1538_v12 = vmax.f32 %v1474_v6, 0.0 }
 0x16d   : > { %v1070_v13 = vpop.f32.mrf.mxu0  ;;  %v1198_v14 = vpop.f32.mrf.mxu1 }
 0x16e   : > { %v2310_v15 = vpack.c.bf16 %v1506_v11, %v1505_v9  ;;  %v2390_v17 = vpack.c.bf16 %v1538_v12, %v1537_v10  ;;  %v1443_v20 = vadd.f32 %v2911_v16, %v1070_v13  ;;  %v1475_v21 = vadd.f32 %v2911_v16, %v1198_v14 }
 0x16f   : > { %v1072_v18 = vpop.f32.mrf.mxu0  ;;  %v1200_v19 = vpop.f32.mrf.mxu1 }
 0x170   : > { %2414 = vst [vmem:[%s2920_s11 + $0x68] sm:$0xff] %v2310_v15   ;;  %2430 = vst [vmem:[%s2920_s11 + $0xe8] sm:$0xff] %v2390_v17   ;;  %v1507_v28 = vmax.f32 %v1443_v20, 0.0  ;;  %v1539_v29 = vmax.f32 %v1475_v21, 0.0 }
 0x171   : > { %v1073_v22 = vpop.f32.mrf.mxu0  ;;  %v1201_v23 = vpop.f32.mrf.mxu1 }
 0x172   : > { %v1444_v24 = vadd.f32 %v2911_v16, %v1073_v22  ;;  %v1476_v25 = vadd.f32 %v2911_v16, %v1201_v23 }
 0x173   : > { %v1075_v26 = vpop.f32.mrf.mxu0  ;;  %v1203_v27 = vpop.f32.mrf.mxu1 }
 0x174   : > { %v1508_v30 = vmax.f32 %v1444_v24, 0.0  ;;  %v1540_v31 = vmax.f32 %v1476_v25, 0.0 }
 0x175   : > { %v1078_v32 = vpop.f32.mrf.mxu0  ;;  %v1206_v33 = vpop.f32.mrf.mxu1 }
 0x176   : > { %v2315_v34 = vpack.c.bf16 %v1508_v30, %v1507_v28  ;;  %v2395_v35 = vpack.c.bf16 %v1540_v31, %v1539_v29  ;;  %v1445_v38 = vadd.f32 %v2911_v16, %v1078_v32  ;;  %v1477_v39 = vadd.f32 %v2911_v16, %v1206_v33 }
 0x177   : > { %v1080_v36 = vpop.f32.mrf.mxu0  ;;  %v1208_v37 = vpop.f32.mrf.mxu1 }
 0x178   : > { %2415 = vst [vmem:[%s2920_s11 + $0x70] sm:$0xff] %v2315_v34   ;;  %2431 = vst [vmem:[%s2920_s11 + $0xf0] sm:$0xff] %v2395_v35   ;;  %v1509_v46 = vmax.f32 %v1445_v38, 0.0  ;;  %v1541_v47 = vmax.f32 %v1477_v39, 0.0 }
 0x179   : > { %v1081_v40 = vpop.f32.mrf.mxu0  ;;  %v1209_v41 = vpop.f32.mrf.mxu1 }
 0x17a   : > { %v1446_v42 = vadd.f32 %v2911_v16, %v1081_v40  ;;  %v1478_v43 = vadd.f32 %v2911_v16, %v1209_v41 }
 0x17b   : > { %v1083_v44 = vpop.f32.mrf.mxu0  ;;  %v1211_v45 = vpop.f32.mrf.mxu1 }
 0x17c   : > { %v1510_v48 = vmax.f32 %v1446_v42, 0.0  ;;  %v1542_v49 = vmax.f32 %v1478_v43, 0.0 }
 0x17e   : > { %v2320_v16 = vpack.c.bf16 %v1510_v48, %v1509_v46  ;;  %v2400_v50 = vpack.c.bf16 %v1542_v49, %v1541_v47 }
 0x180   : > { %2416 = vst [vmem:[%s2920_s11 + $0x78] sm:$0xff] %v2320_v16   ;;  %2432 = vst [vmem:[%s2920_s11 + $0xf8] sm:$0xff] %v2400_v50  }
 0x181   : > { %2631 = shalt.err (!%p2628_p5)
}
 0x182   : > { %s2632_s4 = scalar_lea.hbm %s3017_s26, 4096  ;;  %s2636_s7 = scalar_lea.hbm %s3073_s3, 16384 }
 0x183   : > { %p2633_p6 = scmp.ne.s32.totalorder %s3017_s26, %s2632_s4  ;;  %p2637_p10 = scmp.lt.s32.totalorder %s3017_s26, %s3073_s3 }
 0x184   : > { %p2638_p11 = scmp.lt.s32.totalorder %s2636_s7, %s2632_s4 }
 0x185   : > { %p2634_p7 = pnand %p2633_p6, %p2761_p4 }
 0x186   : > { %p2639_p12 = por %p2638_p11, %p2637_p10 }
 0x187   : > { %p2635_p9 = pneg %p2634_p7 }
 0x189   : > { %p2640_p13 = pnand %p2639_p12, %p2635_p9 }
 0x18b   : > { %2643 = shalt.err (!%p2640_p13)
}
 0x18c   : > { %s2699_s10 = smov 64   ;;  %s2700_s11 = smov 4  }
 0x18d   : > { %2453 = dma.vmem_to_hbm [thread:$0]  (%p2761_p4), %s3019_s19, 4096, %s3017_s26, %s3025_s15, %s2699_s10, %s2699_s10, %s2700_s11  }
 0x18e PF: > { %p2459_p0 = scmp.ge.s32.totalorder %s2694_s17, 2  ;;  %s1893_s18 = sand.u32 1, %s2674_s12  }
 0x18f   : > { %s1894_s21 = scalar_lea.sflag [#allocation4], %s1893_s18 }
 0x190   : > { %p2456_p1 = pnand %p2459_p0, %p2768_p8 }
 0x192   : > { %p2457_p2 = pneg %p2456_p1 }
 0x194   : > { %2669 = dma.done.wait (%p2457_p2), %s1894_s21, 4096  }
 0x195   : > { %2671 = vsyncadd (%p2457_p2), %s1894_s21, 4294963200  ;;  %s16_s17 = sadd.s32 1, %s2694_s17   ;;  %s3076_s12 = smov %s2678_s13 }
 0x196   : > { %p13_p3 = scmp.ge.s32.totalorder %s16_s17, 6   ;;  %s3077_s13 = smov %s2682_s14 }
 0x197   : > { %s3078_s14 = smov %s2774_s25  ;;  %s3079_s15 = smov %s2690_s16 }
 0x198   : > { %s3080_s16 = smov %s3082_s20  ;;  %15 = sbr.rel (!%p13_p3) target bundleno = 4 (0x4), region = 81 }
 0x19d   :  { %1899 = vsyncpa [#allocation4], 1 }
 0x19e   :  { %1901 = vsyncpa [#allocation4 + $0x1], 1 }

</bundles_post_ra>
